<compile_context>
chip_gen: v7x
topology: tpu7x:2x2x1
jax: 0.10.0
libtpu: 0.0.40
codegen_flags: <defaults>
</compile_context>

<pallas_src>
import functools

import jax
import jax.numpy as jnp
from jax.experimental import pallas as pl
from jax.experimental.pallas import tpu as pltpu


def _attention_kernel(x_ref, wqkv_ref, bqkv_ref, wo_ref, bo_ref, o_ref,
                      qkv_scr, ctx_scr,
                      *, num_heads, head_dim, bb, seq_len, causal, approx_recip):
    """One grid step = `bb` batch elements.

    x_ref:    [bb, T, E] bf16
    wqkv_ref: [E, 3E] bf16 (Wq pre-scaled, transposed to [in, out])
    bqkv_ref: [1, 3E] f32  (bq pre-scaled)
    wo_ref:   [E, E]  bf16, bo_ref: [1, E] f32
    qkv_scr:  [bb*T, 3E] bf16 VMEM, ctx_scr: [bb*T, E] bf16 VMEM
    """
    E = num_heads * head_dim
    T = seq_len

    # Flatten batch into the sublane dimension: [bb, T, E] -> [bb*T, E] (leading-dim
    # collapse only; cheap relayout).  Bigger row count = better MXU/sublane fill.
    x = x_ref[...].reshape(bb * T, E)

    # Single fused QKV projection: bf16 operands on the MXU, f32 accumulation,
    # one bias add, one f32->bf16 cast, one store.
    qkv_scr[...] = (jnp.dot(x, wqkv_ref[...], preferred_element_type=jnp.float32)
                    + bqkv_ref[...]).astype(jnp.bfloat16)

    if causal:
        # Additive causal mask: triu(ones, diagonal=1) * -10000 (matches the PyTorch
        # code exactly).  Built once per kernel invocation, reused for every (b, h).
        row = jax.lax.broadcasted_iota(jnp.int32, (T, T), 0)
        col = jax.lax.broadcasted_iota(jnp.int32, (T, T), 1)
        mask = jnp.where(col > row, jnp.float32(-10000.0), jnp.float32(0.0))

    # Per-(batch, head) attention.  Head contexts are scattered (static lane slices)
    # into ctx_scr so the output projection below is one MXU-efficient matmul.
    for b in range(bb):
        r0 = b * T
        for h in range(num_heads):
            lo = h * head_dim
            qh = qkv_scr[r0:r0 + T, lo:lo + head_dim]                    # [T, D] bf16
            kh = qkv_scr[r0:r0 + T, E + lo:E + lo + head_dim]            # [T, D] bf16
            vh = qkv_scr[r0:r0 + T, 2 * E + lo:2 * E + lo + head_dim]    # [T, D] bf16

            # scores = qh @ kh^T  (rhs-transposed contraction, MXU, f32 accumulate)
            s = jax.lax.dot_general(qh, kh, (((1,), (1,)), ((), ())),
                                    preferred_element_type=jnp.float32)  # [T, T]
            if causal:
                s = s + mask
            # softmax along the last axis in float32
            s = s - jnp.max(s, axis=-1, keepdims=True)
            p = jnp.exp(s)
            denom = jnp.sum(p, axis=-1, keepdims=True)
            p = p * pl.reciprocal(denom, approx=approx_recip)

            oh = jnp.dot(p.astype(jnp.bfloat16), vh,
                         preferred_element_type=jnp.float32)             # [T, D]
            ctx_scr[r0:r0 + T, lo:lo + head_dim] = oh.astype(jnp.bfloat16)

    # Single fused output projection: [bb*T, E] @ [E, E] + bias.
    out = (jnp.dot(ctx_scr[...], wo_ref[...], preferred_element_type=jnp.float32)
           + bo_ref[...])
    o_ref[...] = out.reshape(bb, T, E).astype(o_ref.dtype)


def prepare_params(params, *, num_heads):
    """One-time weight prep: transpose to [in, out], cast to bf16, fold Q scaling,
    and fuse Wq/Wk/Wv (and their biases) into a single [E, 3E] / [1, 3E] operand."""
    E = params["q_w"].shape[0]
    head_dim = E // num_heads
    assert head_dim * num_heads == E
    scaling = float(head_dim) ** -0.5

    wq = params["q_w"].T.astype(jnp.float32) * scaling
    wk = params["k_w"].T.astype(jnp.float32)
    wv = params["v_w"].T.astype(jnp.float32)
    wqkv = jnp.concatenate([wq, wk, wv], axis=1).astype(jnp.bfloat16)     # [E, 3E]

    bq = params["q_b"].astype(jnp.float32) * scaling
    bk = params["k_b"].astype(jnp.float32)
    bv = params["v_b"].astype(jnp.float32)
    bqkv = jnp.concatenate([bq, bk, bv]).reshape(1, 3 * E)                # [1, 3E] f32

    return {
        "wqkv": wqkv,
        "bqkv": bqkv,
        "wo": params["o_w"].T.astype(jnp.bfloat16),
        "bo": params["o_b"].reshape(1, E).astype(jnp.float32),
    }


def _num_grid_steps(batch):
    """2 grid steps (batch split across TensorCores) on multi-TC chips (v7x, v4, v5p);
    1 step (grid collapsed over the whole batch) on single-TC chips (v5e/v6e), where a
    multi-step grid is just a serial loop paying ~0.35 us per step."""
    try:
        dev = jax.devices()[0]
        kind = str(getattr(dev, "device_kind", "")).lower()
        multi_tc = any(tag in kind for tag in ("v7", "v4", "v5p"))
    except Exception:  # pragma: no cover - conservative fallback
        multi_tc = False
    if multi_tc and batch > 1 and batch % 2 == 0:
        return 2
    # TODO(synk): for B==1 on v7x, split the grid over heads / q-tiles instead so the
    # second TensorCore is not idle.
    return 1


def self_attention(hidden_states, prepared, *, num_heads, approx_recip=True):
    """hidden_states: [B, T, E] float16. prepared: output of prepare_params().
    Returns bf16 [B, T, E] (no trailing dtype-cast pass over HBM)."""
    B, T, E = hidden_states.shape
    head_dim = E // num_heads
    assert head_dim * num_heads == E
    causal = T > 1

    num_steps = _num_grid_steps(B)
    bb = B // num_steps

    x = hidden_states.astype(jnp.bfloat16)

    kernel = functools.partial(_attention_kernel,
                               num_heads=num_heads,
                               head_dim=head_dim,
                               bb=bb,
                               seq_len=T,
                               causal=causal,
                               approx_recip=approx_recip)

    # VMEM budget with headroom, capped at 48 MiB (below v7x's 64 MiB physical VMEM so
    # Mosaic internal scratch / pipeline buffers keep fitting as shapes grow):
    # double-buffered resident weights + double-buffered x/out blocks + qkv/ctx scratch
    # + per-head f32 scores.
    bytes_weights = 2 * ((E * 3 * E + E * E) * 2 + (3 * E + E) * 4)
    bytes_blocks = 2 * 2 * (bb * T * E * 2)
    bytes_scratch = bb * T * (3 * E + E) * 2 + T * T * 4
    vmem_limit = int(min(48 << 20,
                         max(2 * (bytes_weights + bytes_blocks + bytes_scratch),
                             16 << 20)))

    out = pl.pallas_call(
        kernel,
        out_shape=jax.ShapeDtypeStruct((B, T, E), jnp.bfloat16),
        grid=(num_steps,),
        in_specs=[
            pl.BlockSpec((bb, T, E), lambda i: (i, 0, 0)),      # hidden_states block
            pl.BlockSpec((E, 3 * E), lambda i: (0, 0)),         # fused Wqkv (pre-scaled)
            pl.BlockSpec((1, 3 * E), lambda i: (0, 0)),         # fused bias (pre-scaled)
            pl.BlockSpec((E, E), lambda i: (0, 0)),             # Wo
            pl.BlockSpec((1, E), lambda i: (0, 0)),             # bo
        ],
        out_specs=pl.BlockSpec((bb, T, E), lambda i: (i, 0, 0)),
        scratch_shapes=[pltpu.VMEM((bb * T, 3 * E), jnp.bfloat16),   # fused qkv
                        pltpu.VMEM((bb * T, E), jnp.bfloat16)],      # head contexts
        compiler_params=pltpu.CompilerParams(
            dimension_semantics=("parallel",),
            vmem_limit_bytes=vmem_limit),
    )(x, prepared["wqkv"], prepared["bqkv"], prepared["wo"], prepared["bo"])

    return out


def _reference(hidden_states, params, *, num_heads):
    """Pure-JAX reference (same math, f32) for a sanity check."""
    B, T, E = hidden_states.shape
    D = E // num_heads
    x = hidden_states.astype(jnp.float32)

    def lin(w, b):
        return x @ w.T.astype(jnp.float32) + b.astype(jnp.float32)

    q = lin(params["q_w"], params["q_b"]) * (D ** -0.5)
    k = lin(params["k_w"], params["k_b"])
    v = lin(params["v_w"], params["v_b"])

    def split(t):  # [B,T,E] -> [B,H,T,D]
        return t.reshape(B, T, num_heads, D).transpose(0, 2, 1, 3)

    q, k, v = split(q), split(k), split(v)
    s = jnp.einsum("bhqd,bhkd->bhqk", q, k)
    if T > 1:
        mask = jnp.triu(jnp.ones((T, T), jnp.float32), k=1) * -10000.0
        s = s + mask
    p = jax.nn.softmax(s, axis=-1)
    o = jnp.einsum("bhqk,bhkd->bhqd", p, v)
    o = o.transpose(0, 2, 1, 3).reshape(B, T, E)
    o = o @ params["o_w"].T.astype(jnp.float32) + params["o_b"].astype(jnp.float32)
    return o


if __name__ == "__main__":
    # Small shapes consistent with the module: B=2, T=8, embed_dim=32, num_heads=4.
    B, T, E, H = 2, 8, 32, 4

    key = jax.random.PRNGKey(0)
    ks = jax.random.split(key, 9)

    def w(k):  # deterministic small weights, fp16 like the PyTorch module
        return (jax.random.normal(k, (E, E), jnp.float32) * 0.05).astype(jnp.float16)

    def b(k):
        return (jax.random.normal(k, (E,), jnp.float32) * 0.05).astype(jnp.float16)

    params = {
        "q_w": w(ks[0]), "q_b": b(ks[1]),
        "k_w": w(ks[2]), "k_b": b(ks[3]),
        "v_w": w(ks[4]), "v_b": b(ks[5]),
        "o_w": w(ks[6]), "o_b": b(ks[7]),
    }
    hidden_states = jax.random.normal(ks[8], (B, T, E), jnp.float32).astype(jnp.float16)

    prepared = prepare_params(params, num_heads=H)   # one-time weight prep (hoisted)

    out = self_attention(hidden_states, prepared, num_heads=H)
    out = jax.block_until_ready(out)

    ref = _reference(hidden_states, params, num_heads=H)
    assert out.shape == (B, T, E) and out.dtype == jnp.bfloat16
    assert jnp.allclose(out.astype(jnp.float32), ref,
                        atol=2e-2, rtol=2e-2)
    print("KERNEL_OK")
</pallas_src>

<mosaic_0001>
module attributes {stable_mosaic.version = 11 : i64} {
  func.func @_attention_kernel(%arg0: i32, %arg1: memref<2x8x32xbf16, #tpu.memory_space<vmem>>, %arg2: memref<32x96xbf16, #tpu.memory_space<vmem>>, %arg3: memref<1x96xf32, #tpu.memory_space<vmem>>, %arg4: memref<32x32xbf16, #tpu.memory_space<vmem>>, %arg5: memref<1x32xf32, #tpu.memory_space<vmem>>, %arg6: memref<2x8x32xbf16, #tpu.memory_space<vmem>>, %arg7: memref<16x96xbf16, #tpu.memory_space<vmem>>, %arg8: memref<16x32xbf16, #tpu.memory_space<vmem>>) attributes {dimension_semantics = [#tpu.dimension_semantics<parallel>], iteration_bounds = array<i64: 1>, scalar_prefetch = 0 : i64, scratch_operands = 2 : i64, tpu.core_type = #tpu.core_type<tc>, window_params = [{transform_indices = @transform_0, window_bounds = array<i64: 2, 8, 32>}, {pipeline_mode = #tpu.pipeline_mode<synchronous>, transform_indices = @transform_1, window_bounds = array<i64: 32, 96>}, {pipeline_mode = #tpu.pipeline_mode<synchronous>, transform_indices = @transform_2, window_bounds = array<i64: 1, 96>}, {pipeline_mode = #tpu.pipeline_mode<synchronous>, transform_indices = @transform_3, window_bounds = array<i64: 32, 32>}, {pipeline_mode = #tpu.pipeline_mode<synchronous>, transform_indices = @transform_4, window_bounds = array<i64: 1, 32>}, {transform_indices = @transform_5, window_bounds = array<i64: 2, 8, 32>}]} {
    %c0 = arith.constant 0 : index
    %c0_0 = arith.constant 0 : index
    %c0_1 = arith.constant 0 : index
    %0 = vector.load %arg1[%c0, %c0_0, %c0_1] : memref<2x8x32xbf16, #tpu.memory_space<vmem>>, vector<2x8x32xbf16>
    %1 = vector.shape_cast %0 : vector<2x8x32xbf16> to vector<16x32xbf16>
    %c0_2 = arith.constant 0 : index
    %c0_3 = arith.constant 0 : index
    %2 = vector.load %arg2[%c0_2, %c0_3] : memref<32x96xbf16, #tpu.memory_space<vmem>>, vector<32x96xbf16>
    %cst = arith.constant dense<0.000000e+00> : vector<16x96xf32>
    %3 = tpu.matmul %1, %2, %cst {dimension_numbers = #tpu.dot_dimension_numbers<[1], [0], [0], [1], [0, 0, 1, 1], [], []>} : vector<16x32xbf16>, vector<32x96xbf16>, vector<16x96xf32> -> vector<16x96xf32>
    %c0_4 = arith.constant 0 : index
    %c0_5 = arith.constant 0 : index
    %4 = vector.load %arg3[%c0_4, %c0_5] : memref<1x96xf32, #tpu.memory_space<vmem>>, vector<1x96xf32>
    %5 = vector.broadcast %4 : vector<1x96xf32> to vector<16x96xf32>
    %6 = arith.addf %3, %5 : vector<16x96xf32>
    %7 = arith.truncf %6 : vector<16x96xf32> to vector<16x96xbf16>
    %c0_6 = arith.constant 0 : index
    %c0_7 = arith.constant 0 : index
    %8 = vector.load %arg7[%c0_6, %c0_7] : memref<16x96xbf16, #tpu.memory_space<vmem>>, vector<16x96xbf16>
    tpu.vector_store %arg7[%c0_6, %c0_7], %7 {strides = array<i32>} : memref<16x96xbf16, #tpu.memory_space<vmem>>, vector<16x96xbf16>,
    %9 = tpu.iota {dimensions = array<i32: 0>} : vector<8x8xi32>
    %10 = tpu.iota {dimensions = array<i32: 1>} : vector<8x8xi32>
    %11 = arith.cmpi sgt, %10, %9 : vector<8x8xi32>
    %cst_8 = arith.constant -1.000000e+04 : f32
    %cst_9 = arith.constant 0.000000e+00 : f32
    %12 = vector.broadcast %cst_8 : f32 to vector<8x8xf32>
    %13 = vector.broadcast %cst_9 : f32 to vector<8x8xf32>
    %14 = arith.select %11, %12, %13 : vector<8x8xi1>, vector<8x8xf32>
    %c0_10 = arith.constant 0 : index
    %c0_11 = arith.constant 0 : index
    %15 = vector.load %arg7[%c0_10, %c0_11] : memref<16x96xbf16, #tpu.memory_space<vmem>>, vector<8x8xbf16>
    %c0_12 = arith.constant 0 : index
    %c32 = arith.constant 32 : index
    %16 = vector.load %arg7[%c0_12, %c32] : memref<16x96xbf16, #tpu.memory_space<vmem>>, vector<8x8xbf16>
    %c0_13 = arith.constant 0 : index
    %c64 = arith.constant 64 : index
    %17 = vector.load %arg7[%c0_13, %c64] : memref<16x96xbf16, #tpu.memory_space<vmem>>, vector<8x8xbf16>
    %cst_14 = arith.constant dense<0.000000e+00> : vector<8x8xf32>
    %18 = tpu.matmul %15, %16, %cst_14 {dimension_numbers = #tpu.dot_dimension_numbers<[1], [1], [0], [0], [0, 0, 1, 0], [], []>} : vector<8x8xbf16>, vector<8x8xbf16>, vector<8x8xf32> -> vector<8x8xf32>
    %19 = arith.addf %18, %14 : vector<8x8xf32>
    %cst_15 = arith.constant dense<0xFF800000> : vector<8xf32>
    %20 = vector.multi_reduction <maximumf>, %19, %cst_15 [1] : vector<8x8xf32> to vector<8xf32>
    %21 = vector.shape_cast %20 : vector<8xf32> to vector<8x1xf32>
    %22 = vector.broadcast %21 : vector<8x1xf32> to vector<8x8xf32>
    %23 = arith.subf %19, %22 : vector<8x8xf32>
    %24 = math.exp %23 : vector<8x8xf32>
    %cst_16 = arith.constant dense<0.000000e+00> : vector<8xf32>
    %25 = vector.multi_reduction <add>, %24, %cst_16 [1] : vector<8x8xf32> to vector<8xf32>
    %26 = vector.shape_cast %25 : vector<8xf32> to vector<8x1xf32>
    %27 = tpu.reciprocal %26 {approx = true} : vector<8x1xf32> -> vector<8x1xf32>
    %28 = vector.broadcast %27 : vector<8x1xf32> to vector<8x8xf32>
    %29 = arith.mulf %24, %28 : vector<8x8xf32>
    %30 = arith.truncf %29 : vector<8x8xf32> to vector<8x8xbf16>
    %cst_17 = arith.constant dense<0.000000e+00> : vector<8x8xf32>
    %31 = tpu.matmul %30, %17, %cst_17 {dimension_numbers = #tpu.dot_dimension_numbers<[1], [0], [0], [1], [0, 0, 1, 1], [], []>} : vector<8x8xbf16>, vector<8x8xbf16>, vector<8x8xf32> -> vector<8x8xf32>
    %32 = arith.truncf %31 : vector<8x8xf32> to vector<8x8xbf16>
    %c0_18 = arith.constant 0 : index
    %c0_19 = arith.constant 0 : index
    %33 = vector.load %arg8[%c0_18, %c0_19] : memref<16x32xbf16, #tpu.memory_space<vmem>>, vector<8x8xbf16>
    tpu.vector_store %arg8[%c0_18, %c0_19], %32 {strides = array<i32>} : memref<16x32xbf16, #tpu.memory_space<vmem>>, vector<8x8xbf16>,
    %c0_20 = arith.constant 0 : index
    %c8 = arith.constant 8 : index
    %34 = vector.load %arg7[%c0_20, %c8] : memref<16x96xbf16, #tpu.memory_space<vmem>>, vector<8x8xbf16>
    %c0_21 = arith.constant 0 : index
    %c40 = arith.constant 40 : index
    %35 = vector.load %arg7[%c0_21, %c40] : memref<16x96xbf16, #tpu.memory_space<vmem>>, vector<8x8xbf16>
    %c0_22 = arith.constant 0 : index
    %c72 = arith.constant 72 : index
    %36 = vector.load %arg7[%c0_22, %c72] : memref<16x96xbf16, #tpu.memory_space<vmem>>, vector<8x8xbf16>
    %cst_23 = arith.constant dense<0.000000e+00> : vector<8x8xf32>
    %37 = tpu.matmul %34, %35, %cst_23 {dimension_numbers = #tpu.dot_dimension_numbers<[1], [1], [0], [0], [0, 0, 1, 0], [], []>} : vector<8x8xbf16>, vector<8x8xbf16>, vector<8x8xf32> -> vector<8x8xf32>
    %38 = arith.addf %37, %14 : vector<8x8xf32>
    %cst_24 = arith.constant dense<0xFF800000> : vector<8xf32>
    %39 = vector.multi_reduction <maximumf>, %38, %cst_24 [1] : vector<8x8xf32> to vector<8xf32>
    %40 = vector.shape_cast %39 : vector<8xf32> to vector<8x1xf32>
    %41 = vector.broadcast %40 : vector<8x1xf32> to vector<8x8xf32>
    %42 = arith.subf %38, %41 : vector<8x8xf32>
    %43 = math.exp %42 : vector<8x8xf32>
    %cst_25 = arith.constant dense<0.000000e+00> : vector<8xf32>
    %44 = vector.multi_reduction <add>, %43, %cst_25 [1] : vector<8x8xf32> to vector<8xf32>
    %45 = vector.shape_cast %44 : vector<8xf32> to vector<8x1xf32>
    %46 = tpu.reciprocal %45 {approx = true} : vector<8x1xf32> -> vector<8x1xf32>
    %47 = vector.broadcast %46 : vector<8x1xf32> to vector<8x8xf32>
    %48 = arith.mulf %43, %47 : vector<8x8xf32>
    %49 = arith.truncf %48 : vector<8x8xf32> to vector<8x8xbf16>
    %cst_26 = arith.constant dense<0.000000e+00> : vector<8x8xf32>
    %50 = tpu.matmul %49, %36, %cst_26 {dimension_numbers = #tpu.dot_dimension_numbers<[1], [0], [0], [1], [0, 0, 1, 1], [], []>} : vector<8x8xbf16>, vector<8x8xbf16>, vector<8x8xf32> -> vector<8x8xf32>
    %51 = arith.truncf %50 : vector<8x8xf32> to vector<8x8xbf16>
    %c0_27 = arith.constant 0 : index
    %c8_28 = arith.constant 8 : index
    %52 = vector.load %arg8[%c0_27, %c8_28] : memref<16x32xbf16, #tpu.memory_space<vmem>>, vector<8x8xbf16>
    tpu.vector_store %arg8[%c0_27, %c8_28], %51 {strides = array<i32>} : memref<16x32xbf16, #tpu.memory_space<vmem>>, vector<8x8xbf16>,
    %c0_29 = arith.constant 0 : index
    %c16 = arith.constant 16 : index
    %53 = vector.load %arg7[%c0_29, %c16] : memref<16x96xbf16, #tpu.memory_space<vmem>>, vector<8x8xbf16>
    %c0_30 = arith.constant 0 : index
    %c48 = arith.constant 48 : index
    %54 = vector.load %arg7[%c0_30, %c48] : memref<16x96xbf16, #tpu.memory_space<vmem>>, vector<8x8xbf16>
    %c0_31 = arith.constant 0 : index
    %c80 = arith.constant 80 : index
    %55 = vector.load %arg7[%c0_31, %c80] : memref<16x96xbf16, #tpu.memory_space<vmem>>, vector<8x8xbf16>
    %cst_32 = arith.constant dense<0.000000e+00> : vector<8x8xf32>
    %56 = tpu.matmul %53, %54, %cst_32 {dimension_numbers = #tpu.dot_dimension_numbers<[1], [1], [0], [0], [0, 0, 1, 0], [], []>} : vector<8x8xbf16>, vector<8x8xbf16>, vector<8x8xf32> -> vector<8x8xf32>
    %57 = arith.addf %56, %14 : vector<8x8xf32>
    %cst_33 = arith.constant dense<0xFF800000> : vector<8xf32>
    %58 = vector.multi_reduction <maximumf>, %57, %cst_33 [1] : vector<8x8xf32> to vector<8xf32>
    %59 = vector.shape_cast %58 : vector<8xf32> to vector<8x1xf32>
    %60 = vector.broadcast %59 : vector<8x1xf32> to vector<8x8xf32>
    %61 = arith.subf %57, %60 : vector<8x8xf32>
    %62 = math.exp %61 : vector<8x8xf32>
    %cst_34 = arith.constant dense<0.000000e+00> : vector<8xf32>
    %63 = vector.multi_reduction <add>, %62, %cst_34 [1] : vector<8x8xf32> to vector<8xf32>
    %64 = vector.shape_cast %63 : vector<8xf32> to vector<8x1xf32>
    %65 = tpu.reciprocal %64 {approx = true} : vector<8x1xf32> -> vector<8x1xf32>
    %66 = vector.broadcast %65 : vector<8x1xf32> to vector<8x8xf32>
    %67 = arith.mulf %62, %66 : vector<8x8xf32>
    %68 = arith.truncf %67 : vector<8x8xf32> to vector<8x8xbf16>
    %cst_35 = arith.constant dense<0.000000e+00> : vector<8x8xf32>
    %69 = tpu.matmul %68, %55, %cst_35 {dimension_numbers = #tpu.dot_dimension_numbers<[1], [0], [0], [1], [0, 0, 1, 1], [], []>} : vector<8x8xbf16>, vector<8x8xbf16>, vector<8x8xf32> -> vector<8x8xf32>
    %70 = arith.truncf %69 : vector<8x8xf32> to vector<8x8xbf16>
    %c0_36 = arith.constant 0 : index
    %c16_37 = arith.constant 16 : index
    %71 = vector.load %arg8[%c0_36, %c16_37] : memref<16x32xbf16, #tpu.memory_space<vmem>>, vector<8x8xbf16>
    tpu.vector_store %arg8[%c0_36, %c16_37], %70 {strides = array<i32>} : memref<16x32xbf16, #tpu.memory_space<vmem>>, vector<8x8xbf16>,
    %c0_38 = arith.constant 0 : index
    %c24 = arith.constant 24 : index
    %72 = vector.load %arg7[%c0_38, %c24] : memref<16x96xbf16, #tpu.memory_space<vmem>>, vector<8x8xbf16>
    %c0_39 = arith.constant 0 : index
    %c56 = arith.constant 56 : index
    %73 = vector.load %arg7[%c0_39, %c56] : memref<16x96xbf16, #tpu.memory_space<vmem>>, vector<8x8xbf16>
    %c0_40 = arith.constant 0 : index
    %c88 = arith.constant 88 : index
    %74 = vector.load %arg7[%c0_40, %c88] : memref<16x96xbf16, #tpu.memory_space<vmem>>, vector<8x8xbf16>
    %cst_41 = arith.constant dense<0.000000e+00> : vector<8x8xf32>
    %75 = tpu.matmul %72, %73, %cst_41 {dimension_numbers = #tpu.dot_dimension_numbers<[1], [1], [0], [0], [0, 0, 1, 0], [], []>} : vector<8x8xbf16>, vector<8x8xbf16>, vector<8x8xf32> -> vector<8x8xf32>
    %76 = arith.addf %75, %14 : vector<8x8xf32>
    %cst_42 = arith.constant dense<0xFF800000> : vector<8xf32>
    %77 = vector.multi_reduction <maximumf>, %76, %cst_42 [1] : vector<8x8xf32> to vector<8xf32>
    %78 = vector.shape_cast %77 : vector<8xf32> to vector<8x1xf32>
    %79 = vector.broadcast %78 : vector<8x1xf32> to vector<8x8xf32>
    %80 = arith.subf %76, %79 : vector<8x8xf32>
    %81 = math.exp %80 : vector<8x8xf32>
    %cst_43 = arith.constant dense<0.000000e+00> : vector<8xf32>
    %82 = vector.multi_reduction <add>, %81, %cst_43 [1] : vector<8x8xf32> to vector<8xf32>
    %83 = vector.shape_cast %82 : vector<8xf32> to vector<8x1xf32>
    %84 = tpu.reciprocal %83 {approx = true} : vector<8x1xf32> -> vector<8x1xf32>
    %85 = vector.broadcast %84 : vector<8x1xf32> to vector<8x8xf32>
    %86 = arith.mulf %81, %85 : vector<8x8xf32>
    %87 = arith.truncf %86 : vector<8x8xf32> to vector<8x8xbf16>
    %cst_44 = arith.constant dense<0.000000e+00> : vector<8x8xf32>
    %88 = tpu.matmul %87, %74, %cst_44 {dimension_numbers = #tpu.dot_dimension_numbers<[1], [0], [0], [1], [0, 0, 1, 1], [], []>} : vector<8x8xbf16>, vector<8x8xbf16>, vector<8x8xf32> -> vector<8x8xf32>
    %89 = arith.truncf %88 : vector<8x8xf32> to vector<8x8xbf16>
    %c0_45 = arith.constant 0 : index
    %c24_46 = arith.constant 24 : index
    %90 = vector.load %arg8[%c0_45, %c24_46] : memref<16x32xbf16, #tpu.memory_space<vmem>>, vector<8x8xbf16>
    tpu.vector_store %arg8[%c0_45, %c24_46], %89 {strides = array<i32>} : memref<16x32xbf16, #tpu.memory_space<vmem>>, vector<8x8xbf16>,
    %c8_47 = arith.constant 8 : index
    %c0_48 = arith.constant 0 : index
    %91 = vector.load %arg7[%c8_47, %c0_48] : memref<16x96xbf16, #tpu.memory_space<vmem>>, vector<8x8xbf16>
    %c8_49 = arith.constant 8 : index
    %c32_50 = arith.constant 32 : index
    %92 = vector.load %arg7[%c8_49, %c32_50] : memref<16x96xbf16, #tpu.memory_space<vmem>>, vector<8x8xbf16>
    %c8_51 = arith.constant 8 : index
    %c64_52 = arith.constant 64 : index
    %93 = vector.load %arg7[%c8_51, %c64_52] : memref<16x96xbf16, #tpu.memory_space<vmem>>, vector<8x8xbf16>
    %cst_53 = arith.constant dense<0.000000e+00> : vector<8x8xf32>
    %94 = tpu.matmul %91, %92, %cst_53 {dimension_numbers = #tpu.dot_dimension_numbers<[1], [1], [0], [0], [0, 0, 1, 0], [], []>} : vector<8x8xbf16>, vector<8x8xbf16>, vector<8x8xf32> -> vector<8x8xf32>
    %95 = arith.addf %94, %14 : vector<8x8xf32>
    %cst_54 = arith.constant dense<0xFF800000> : vector<8xf32>
    %96 = vector.multi_reduction <maximumf>, %95, %cst_54 [1] : vector<8x8xf32> to vector<8xf32>
    %97 = vector.shape_cast %96 : vector<8xf32> to vector<8x1xf32>
    %98 = vector.broadcast %97 : vector<8x1xf32> to vector<8x8xf32>
    %99 = arith.subf %95, %98 : vector<8x8xf32>
    %100 = math.exp %99 : vector<8x8xf32>
    %cst_55 = arith.constant dense<0.000000e+00> : vector<8xf32>
    %101 = vector.multi_reduction <add>, %100, %cst_55 [1] : vector<8x8xf32> to vector<8xf32>
    %102 = vector.shape_cast %101 : vector<8xf32> to vector<8x1xf32>
    %103 = tpu.reciprocal %102 {approx = true} : vector<8x1xf32> -> vector<8x1xf32>
    %104 = vector.broadcast %103 : vector<8x1xf32> to vector<8x8xf32>
    %105 = arith.mulf %100, %104 : vector<8x8xf32>
    %106 = arith.truncf %105 : vector<8x8xf32> to vector<8x8xbf16>
    %cst_56 = arith.constant dense<0.000000e+00> : vector<8x8xf32>
    %107 = tpu.matmul %106, %93, %cst_56 {dimension_numbers = #tpu.dot_dimension_numbers<[1], [0], [0], [1], [0, 0, 1, 1], [], []>} : vector<8x8xbf16>, vector<8x8xbf16>, vector<8x8xf32> -> vector<8x8xf32>
    %108 = arith.truncf %107 : vector<8x8xf32> to vector<8x8xbf16>
    %c8_57 = arith.constant 8 : index
    %c0_58 = arith.constant 0 : index
    %109 = vector.load %arg8[%c8_57, %c0_58] : memref<16x32xbf16, #tpu.memory_space<vmem>>, vector<8x8xbf16>
    tpu.vector_store %arg8[%c8_57, %c0_58], %108 {strides = array<i32>} : memref<16x32xbf16, #tpu.memory_space<vmem>>, vector<8x8xbf16>,
    %c8_59 = arith.constant 8 : index
    %c8_60 = arith.constant 8 : index
    %110 = vector.load %arg7[%c8_59, %c8_60] : memref<16x96xbf16, #tpu.memory_space<vmem>>, vector<8x8xbf16>
    %c8_61 = arith.constant 8 : index
    %c40_62 = arith.constant 40 : index
    %111 = vector.load %arg7[%c8_61, %c40_62] : memref<16x96xbf16, #tpu.memory_space<vmem>>, vector<8x8xbf16>
    %c8_63 = arith.constant 8 : index
    %c72_64 = arith.constant 72 : index
    %112 = vector.load %arg7[%c8_63, %c72_64] : memref<16x96xbf16, #tpu.memory_space<vmem>>, vector<8x8xbf16>
    %cst_65 = arith.constant dense<0.000000e+00> : vector<8x8xf32>
    %113 = tpu.matmul %110, %111, %cst_65 {dimension_numbers = #tpu.dot_dimension_numbers<[1], [1], [0], [0], [0, 0, 1, 0], [], []>} : vector<8x8xbf16>, vector<8x8xbf16>, vector<8x8xf32> -> vector<8x8xf32>
    %114 = arith.addf %113, %14 : vector<8x8xf32>
    %cst_66 = arith.constant dense<0xFF800000> : vector<8xf32>
    %115 = vector.multi_reduction <maximumf>, %114, %cst_66 [1] : vector<8x8xf32> to vector<8xf32>
    %116 = vector.shape_cast %115 : vector<8xf32> to vector<8x1xf32>
    %117 = vector.broadcast %116 : vector<8x1xf32> to vector<8x8xf32>
    %118 = arith.subf %114, %117 : vector<8x8xf32>
    %119 = math.exp %118 : vector<8x8xf32>
    %cst_67 = arith.constant dense<0.000000e+00> : vector<8xf32>
    %120 = vector.multi_reduction <add>, %119, %cst_67 [1] : vector<8x8xf32> to vector<8xf32>
    %121 = vector.shape_cast %120 : vector<8xf32> to vector<8x1xf32>
    %122 = tpu.reciprocal %121 {approx = true} : vector<8x1xf32> -> vector<8x1xf32>
    %123 = vector.broadcast %122 : vector<8x1xf32> to vector<8x8xf32>
    %124 = arith.mulf %119, %123 : vector<8x8xf32>
    %125 = arith.truncf %124 : vector<8x8xf32> to vector<8x8xbf16>
    %cst_68 = arith.constant dense<0.000000e+00> : vector<8x8xf32>
    %126 = tpu.matmul %125, %112, %cst_68 {dimension_numbers = #tpu.dot_dimension_numbers<[1], [0], [0], [1], [0, 0, 1, 1], [], []>} : vector<8x8xbf16>, vector<8x8xbf16>, vector<8x8xf32> -> vector<8x8xf32>
    %127 = arith.truncf %126 : vector<8x8xf32> to vector<8x8xbf16>
    %c8_69 = arith.constant 8 : index
    %c8_70 = arith.constant 8 : index
    %128 = vector.load %arg8[%c8_69, %c8_70] : memref<16x32xbf16, #tpu.memory_space<vmem>>, vector<8x8xbf16>
    tpu.vector_store %arg8[%c8_69, %c8_70], %127 {strides = array<i32>} : memref<16x32xbf16, #tpu.memory_space<vmem>>, vector<8x8xbf16>,
    %c8_71 = arith.constant 8 : index
    %c16_72 = arith.constant 16 : index
    %129 = vector.load %arg7[%c8_71, %c16_72] : memref<16x96xbf16, #tpu.memory_space<vmem>>, vector<8x8xbf16>
    %c8_73 = arith.constant 8 : index
    %c48_74 = arith.constant 48 : index
    %130 = vector.load %arg7[%c8_73, %c48_74] : memref<16x96xbf16, #tpu.memory_space<vmem>>, vector<8x8xbf16>
    %c8_75 = arith.constant 8 : index
    %c80_76 = arith.constant 80 : index
    %131 = vector.load %arg7[%c8_75, %c80_76] : memref<16x96xbf16, #tpu.memory_space<vmem>>, vector<8x8xbf16>
    %cst_77 = arith.constant dense<0.000000e+00> : vector<8x8xf32>
    %132 = tpu.matmul %129, %130, %cst_77 {dimension_numbers = #tpu.dot_dimension_numbers<[1], [1], [0], [0], [0, 0, 1, 0], [], []>} : vector<8x8xbf16>, vector<8x8xbf16>, vector<8x8xf32> -> vector<8x8xf32>
    %133 = arith.addf %132, %14 : vector<8x8xf32>
    %cst_78 = arith.constant dense<0xFF800000> : vector<8xf32>
    %134 = vector.multi_reduction <maximumf>, %133, %cst_78 [1] : vector<8x8xf32> to vector<8xf32>
    %135 = vector.shape_cast %134 : vector<8xf32> to vector<8x1xf32>
    %136 = vector.broadcast %135 : vector<8x1xf32> to vector<8x8xf32>
    %137 = arith.subf %133, %136 : vector<8x8xf32>
    %138 = math.exp %137 : vector<8x8xf32>
    %cst_79 = arith.constant dense<0.000000e+00> : vector<8xf32>
    %139 = vector.multi_reduction <add>, %138, %cst_79 [1] : vector<8x8xf32> to vector<8xf32>
    %140 = vector.shape_cast %139 : vector<8xf32> to vector<8x1xf32>
    %141 = tpu.reciprocal %140 {approx = true} : vector<8x1xf32> -> vector<8x1xf32>
    %142 = vector.broadcast %141 : vector<8x1xf32> to vector<8x8xf32>
    %143 = arith.mulf %138, %142 : vector<8x8xf32>
    %144 = arith.truncf %143 : vector<8x8xf32> to vector<8x8xbf16>
    %cst_80 = arith.constant dense<0.000000e+00> : vector<8x8xf32>
    %145 = tpu.matmul %144, %131, %cst_80 {dimension_numbers = #tpu.dot_dimension_numbers<[1], [0], [0], [1], [0, 0, 1, 1], [], []>} : vector<8x8xbf16>, vector<8x8xbf16>, vector<8x8xf32> -> vector<8x8xf32>
    %146 = arith.truncf %145 : vector<8x8xf32> to vector<8x8xbf16>
    %c8_81 = arith.constant 8 : index
    %c16_82 = arith.constant 16 : index
    %147 = vector.load %arg8[%c8_81, %c16_82] : memref<16x32xbf16, #tpu.memory_space<vmem>>, vector<8x8xbf16>
    tpu.vector_store %arg8[%c8_81, %c16_82], %146 {strides = array<i32>} : memref<16x32xbf16, #tpu.memory_space<vmem>>, vector<8x8xbf16>,
    %c8_83 = arith.constant 8 : index
    %c24_84 = arith.constant 24 : index
    %148 = vector.load %arg7[%c8_83, %c24_84] : memref<16x96xbf16, #tpu.memory_space<vmem>>, vector<8x8xbf16>
    %c8_85 = arith.constant 8 : index
    %c56_86 = arith.constant 56 : index
    %149 = vector.load %arg7[%c8_85, %c56_86] : memref<16x96xbf16, #tpu.memory_space<vmem>>, vector<8x8xbf16>
    %c8_87 = arith.constant 8 : index
    %c88_88 = arith.constant 88 : index
    %150 = vector.load %arg7[%c8_87, %c88_88] : memref<16x96xbf16, #tpu.memory_space<vmem>>, vector<8x8xbf16>
    %cst_89 = arith.constant dense<0.000000e+00> : vector<8x8xf32>
    %151 = tpu.matmul %148, %149, %cst_89 {dimension_numbers = #tpu.dot_dimension_numbers<[1], [1], [0], [0], [0, 0, 1, 0], [], []>} : vector<8x8xbf16>, vector<8x8xbf16>, vector<8x8xf32> -> vector<8x8xf32>
    %152 = arith.addf %151, %14 : vector<8x8xf32>
    %cst_90 = arith.constant dense<0xFF800000> : vector<8xf32>
    %153 = vector.multi_reduction <maximumf>, %152, %cst_90 [1] : vector<8x8xf32> to vector<8xf32>
    %154 = vector.shape_cast %153 : vector<8xf32> to vector<8x1xf32>
    %155 = vector.broadcast %154 : vector<8x1xf32> to vector<8x8xf32>
    %156 = arith.subf %152, %155 : vector<8x8xf32>
    %157 = math.exp %156 : vector<8x8xf32>
    %cst_91 = arith.constant dense<0.000000e+00> : vector<8xf32>
    %158 = vector.multi_reduction <add>, %157, %cst_91 [1] : vector<8x8xf32> to vector<8xf32>
    %159 = vector.shape_cast %158 : vector<8xf32> to vector<8x1xf32>
    %160 = tpu.reciprocal %159 {approx = true} : vector<8x1xf32> -> vector<8x1xf32>
    %161 = vector.broadcast %160 : vector<8x1xf32> to vector<8x8xf32>
    %162 = arith.mulf %157, %161 : vector<8x8xf32>
    %163 = arith.truncf %162 : vector<8x8xf32> to vector<8x8xbf16>
    %cst_92 = arith.constant dense<0.000000e+00> : vector<8x8xf32>
    %164 = tpu.matmul %163, %150, %cst_92 {dimension_numbers = #tpu.dot_dimension_numbers<[1], [0], [0], [1], [0, 0, 1, 1], [], []>} : vector<8x8xbf16>, vector<8x8xbf16>, vector<8x8xf32> -> vector<8x8xf32>
    %165 = arith.truncf %164 : vector<8x8xf32> to vector<8x8xbf16>
    %c8_93 = arith.constant 8 : index
    %c24_94 = arith.constant 24 : index
    %166 = vector.load %arg8[%c8_93, %c24_94] : memref<16x32xbf16, #tpu.memory_space<vmem>>, vector<8x8xbf16>
    tpu.vector_store %arg8[%c8_93, %c24_94], %165 {strides = array<i32>} : memref<16x32xbf16, #tpu.memory_space<vmem>>, vector<8x8xbf16>,
    %c0_95 = arith.constant 0 : index
    %c0_96 = arith.constant 0 : index
    %167 = vector.load %arg8[%c0_95, %c0_96] : memref<16x32xbf16, #tpu.memory_space<vmem>>, vector<16x32xbf16>
    %c0_97 = arith.constant 0 : index
    %c0_98 = arith.constant 0 : index
    %168 = vector.load %arg4[%c0_97, %c0_98] : memref<32x32xbf16, #tpu.memory_space<vmem>>, vector<32x32xbf16>
    %cst_99 = arith.constant dense<0.000000e+00> : vector<16x32xf32>
    %169 = tpu.matmul %167, %168, %cst_99 {dimension_numbers = #tpu.dot_dimension_numbers<[1], [0], [0], [1], [0, 0, 1, 1], [], []>} : vector<16x32xbf16>, vector<32x32xbf16>, vector<16x32xf32> -> vector<16x32xf32>
    %c0_100 = arith.constant 0 : index
    %c0_101 = arith.constant 0 : index
    %170 = vector.load %arg5[%c0_100, %c0_101] : memref<1x32xf32, #tpu.memory_space<vmem>>, vector<1x32xf32>
    %171 = vector.broadcast %170 : vector<1x32xf32> to vector<16x32xf32>
    %172 = arith.addf %169, %171 : vector<16x32xf32>
    %173 = vector.shape_cast %172 : vector<16x32xf32> to vector<2x8x32xf32>
    %174 = arith.truncf %173 : vector<2x8x32xf32> to vector<2x8x32xbf16>
    %c0_102 = arith.constant 0 : index
    %c0_103 = arith.constant 0 : index
    %c0_104 = arith.constant 0 : index
    %175 = vector.load %arg6[%c0_102, %c0_103, %c0_104] : memref<2x8x32xbf16, #tpu.memory_space<vmem>>, vector<2x8x32xbf16>
    tpu.vector_store %arg6[%c0_102, %c0_103, %c0_104], %174 {strides = array<i32>} : memref<2x8x32xbf16, #tpu.memory_space<vmem>>, vector<2x8x32xbf16>,
    return
  }
  func.func @transform_0(%arg0: i32) -> (i32, i32, i32) {
    %c0_i32 = arith.constant 0 : i32
    %c0_i32_0 = arith.constant 0 : i32
    %c0_i32_1 = arith.constant 0 : i32
    return %arg0, %c0_i32, %c0_i32_0 : i32, i32, i32
  }
  func.func @transform_1(%arg0: i32) -> (i32, i32) {
    %c0_i32 = arith.constant 0 : i32
    %c0_i32_0 = arith.constant 0 : i32
    %c0_i32_1 = arith.constant 0 : i32
    return %c0_i32, %c0_i32_0 : i32, i32
  }
  func.func @transform_2(%arg0: i32) -> (i32, i32) {
    %c0_i32 = arith.constant 0 : i32
    %c0_i32_0 = arith.constant 0 : i32
    %c0_i32_1 = arith.constant 0 : i32
    return %c0_i32, %c0_i32_0 : i32, i32
  }
  func.func @transform_3(%arg0: i32) -> (i32, i32) {
    %c0_i32 = arith.constant 0 : i32
    %c0_i32_0 = arith.constant 0 : i32
    %c0_i32_1 = arith.constant 0 : i32
    return %c0_i32, %c0_i32_0 : i32, i32
  }
  func.func @transform_4(%arg0: i32) -> (i32, i32) {
    %c0_i32 = arith.constant 0 : i32
    %c0_i32_0 = arith.constant 0 : i32
    %c0_i32_1 = arith.constant 0 : i32
    return %c0_i32, %c0_i32_0 : i32, i32
  }
  func.func @transform_5(%arg0: i32) -> (i32, i32, i32) {
    %c0_i32 = arith.constant 0 : i32
    %c0_i32_0 = arith.constant 0 : i32
    %c0_i32_1 = arith.constant 0 : i32
    return %arg0, %c0_i32, %c0_i32_0 : i32, i32, i32
  }
}

</mosaic_0001>

<bundles_post_ra>
// kernel: tpu_custom_call.1
= control target key start
LH: loop header
LB: loop body
LE: loop exit
PB: predicated region body
PF: predicated region fallthrough
CT: control target
= control target key end

     0   :  { %10 = vsyncpa [#allocation5], 0  ;;  %s1846_s0 = inlined_call_operand.hbm [shape: bf16[2,8,32], index: 0, kind: input, shape index: {}]   ;;  %s1847_s1 = inlined_call_operand.hbm [shape: bf16[32,96], index: 1, kind: input, shape index: {}]   ;;  %s1848_s2 = inlined_call_operand.vmem [shape: f32[1,96], index: 2, kind: input, shape index: {}]   ;;  %s1849_s3 = inlined_call_operand.hbm [shape: bf16[32,32], index: 3, kind: input, shape index: {}]   ;;  %s1850_s4 = inlined_call_operand.vmem [shape: f32[1,32], index: 4, kind: input, shape index: {}]   ;;  %s1851_s5 = inlined_call_operand.hbm [shape: bf16[2,8,32], index: 5, kind: output, shape index: {}]  }
   0x1   :  { %11 = vsyncpa [#allocation8], 0 }
   0x2   :  { %12 = vsyncpa [#allocation6], 0  ;;  %s1517_s18 = smov [#allocation7]   ;;  %s1518_s20 = smov [#allocation4]  }
   0x3   :  { %s30_s19 = sshll.u32 %s1517_s18, 4  ;;  %s18_s21 = sshll.u32 %s1518_s20, 4  ;;  %s31_s19 = int_to_ptr.vmem [resolvable:$true] %s30_s19  ;;  %s1568_s21 = int_to_ptr.vmem [resolvable:$true] %s18_s21 }
   0x4   :  { %s1423_s24 = scalar_lea.hbm %s1847_s1, 256 }
   0x5   :  { %p1424_p0 = scmp.ne.s32.totalorder %s1847_s1, %s1423_s24  ;;  %p1427_p1 = scmp.lt.u32.totalorder %s1423_s24, %s1847_s1 }
   0x7   :  { %p1429_p2 = pnand %p1427_p1, %p1424_p0 }
   0x9   :  { %1432 = shalt.err (!%p1429_p2)
}
   0xa   :  { %s1433_s29 = scalar_lea.vmem %s31_s19, 256  ;;  %p1438_p4 = scmp.lt.s32.totalorder %s31_s19, %s31_s19 }
   0xb   :  { %p1434_p3 = scmp.ne.s32.totalorder %s31_s19, %s1433_s29  ;;  %p1439_p5 = scmp.lt.s32.totalorder %s1433_s29, %s1433_s29 }
   0xd   :  { %p1440_p6 = por %p1439_p5, %p1438_p4 }
   0xf   :  { %p1441_p7 = pnand %p1440_p6, %p1434_p3 }
  0x11   :  { %1444 = shalt.err (!%p1441_p7)
}
  0x12   :  { %s1519_s30 = smov 64   ;;  %s1520_s6 = smov 4  }
  0x13   :  { %36 = dma.hbm_to_vmem [thread:$0]  %s1847_s1, 256, %s31_s19, [#allocation8], %s1519_s30, %s1519_s30, %s1520_s6  }
  0x14   :  { %s1445_s11 = scalar_lea.hbm %s1846_s0, 128 }
  0x15   :  { %p1446_p8 = scmp.ne.s32.totalorder %s1846_s0, %s1445_s11  ;;  %p1449_p9 = scmp.lt.u32.totalorder %s1445_s11, %s1846_s0 }
  0x17   :  { %p1451_p10 = pnand %p1449_p9, %p1446_p8 }
  0x19   :  { %1454 = shalt.err (!%p1451_p10)
}
  0x1a   :  { %s1455_s16 = scalar_lea.vmem %s1568_s21, 128  ;;  %p1460_p12 = scmp.lt.s32.totalorder %s1568_s21, %s1568_s21 }
  0x1b   :  { %p1456_p11 = scmp.ne.s32.totalorder %s1568_s21, %s1455_s16  ;;  %p1461_p13 = scmp.lt.s32.totalorder %s1455_s16, %s1455_s16 }
  0x1d   :  { %p1462_p0 = por %p1461_p13, %p1460_p12 }
  0x1f   :  { %p1463_p1 = pnand %p1462_p0, %p1456_p11 }
  0x21   :  { %1466 = shalt.err (!%p1463_p1)
}
  0x22   :  { %24 = dma.hbm_to_vmem [thread:$0]  %s1846_s0, 128, %s1568_s21, [#allocation5], %s1519_s30, %s1519_s30, %s1520_s6  }
  0x23   :  { %s1521_s18 = smov [#allocation9]   ;;  %s1467_s23 = scalar_lea.hbm %s1849_s3, 256 }
  0x24   :  { %s44_s19 = sshll.u32 %s1521_s18, 4  ;;  %p1468_p2 = scmp.ne.s32.totalorder %s1849_s3, %s1467_s23  ;;  %s45_s19 = int_to_ptr.vmem [resolvable:$true] %s44_s19 }
  0x25   :  { %p1471_p3 = scmp.lt.u32.totalorder %s1467_s23, %s1849_s3 }
  0x27   :  { %p1473_p4 = pnand %p1471_p3, %p1468_p2 }
  0x29   :  { %1476 = shalt.err (!%p1473_p4)
}
  0x2a   :  { %s1477_s28 = scalar_lea.vmem %s45_s19, 256  ;;  %p1482_p6 = scmp.lt.s32.totalorder %s45_s19, %s45_s19 }
  0x2b   :  { %p1478_p5 = scmp.ne.s32.totalorder %s45_s19, %s1477_s28  ;;  %p1483_p7 = scmp.lt.s32.totalorder %s1477_s28, %s1477_s28 }
  0x2d   :  { %p1484_p8 = por %p1483_p7, %p1482_p6 }
  0x2f   :  { %p1485_p9 = pnand %p1484_p8, %p1478_p5 }
  0x31   :  { %1488 = shalt.err (!%p1485_p9)
}
  0x32   :  { %50 = dma.hbm_to_vmem [thread:$0]  %s1849_s3, 256, %s45_s19, [#allocation8], %s1519_s30, %s1519_s30, %s1520_s6  }
  0x33   :  { %1511 = dma.done.wait [#allocation5], 128  }
  0x34   :  { %1512 = vsyncadd [#allocation5], 4294967168 }
  0x35   :  { %1513 = dma.done.wait [#allocation8], 512  }
  0x36   :  { %1514 = vsyncadd [#allocation8], 4294966784  ;;  %v1522_v0 = vmov 0.0   ;;  %vm1523_vm0 = vmmov 0   ;;  %v1386_v1 = vld [vmem:[#allocation7] sm:$0xff]   ;;  %v1387_v2 = vld [vmem:[#allocation7 + $0x8] sm:$0xff]   ;;  %v141_v46 = vlaneseq }
  0x37   :  { %1253 = vmatprep.subr.bf16.mxu0 %v1522_v0  ;;  %1257 = vmatprep.mubr.msk.bf16.mxu0 %vm1523_vm0, %v1522_v0  ;;  %v1388_v3 = vld [vmem:[#allocation4] sm:$0xff]   ;;  %vm93_vm1 = vcmask 261120   ;;  %v1190_v4 = vld [vmem:[%s1848_s2] ss:$0 sm:$0xff]  ;;  %vm139_vm2 = vcmask 785408   ;;  %s1524_s7 = smov 120  }
  0x38   :  { %1261 = vmatprep.subr.bf16.mxu1 %v1522_v0  ;;  %1263 = vmatprep.mubr.msk.bf16.mxu1 %vm1523_vm0, %v1522_v0  ;;  %s1525_s8 = smov 96   ;;  %s1526_s2 = smov 80   ;;  %vm151_vm3 = vcmask 64512   ;;  %v142_v47 = vshrl.u32 %v141_v46, 7  ;;  %v144_v48 = vand.u32 127, %v141_v46  ;;  %vm215_vm5 = vcmask 1043456  }
  0x39   :  { %1254 = vmatpush3.bf16.msra.mxu0 %v1386_v1  ;;  %s1527_s9 = smov 88   ;;  %s1528_s10 = smov 72   ;;  %vm260_vm6 = vcmask 60416   ;;  %vm734_vm7 = vcmask 64516   ;;  %vm379_vm8 = vcmask 126016   ;;  %vm498_vm9 = vcmask 191616  }
  0x3a   :  { %1255 = vmatprep.subr.bf16.mxu0 %v1522_v0  ;;  %s1529_s11 = smov 112   ;;  %s1530_s12 = smov 104   ;;  %vm145_vm4 = vcmp.gt.s32.totalorder %v144_v48, %v142_v47  ;;  %vm617_vm10 = vcmask 257216   ;;  %vm855_vm11 = vcmask 130116   ;;  %vm976_vm12 = vcmask 195716  }
  0x3b   :  { %v146_v49 = vsel %vm145_vm4, -10000.0, %v1522_v0  ;;  %s1531_s13 = smov 56   ;;  %s1532_s14 = smov 48   ;;  %vm1097_vm13 = vcmask 261316   ;;  %vm1169_vm14 = vcmask 257024  }
  0x3c   :  { %s1533_s15 = smov 40   ;;  %s1534_s16 = smov 8  }
  0x3d   :  { %1256 = vmatpush3.bf16.msra.mxu0 %v1387_v2  ;;  %s1535_s1 = smov 16   ;;  %s1536_s17 = smov 24  }
  0x3e   :  { %1267 = vmatprep.subr.bf16.mxu0 %v1522_v0  ;;  %s1537_s20 = smov [#allocation10]  }
  0x3f   :  { %s1177_s22 = sshll.u32 %s1537_s20, 4  ;;  %s1178_s22 = int_to_ptr.vmem [resolvable:$true] %s1177_s22 }
  0x40   :  { %1258 = vmatmul.mubr.msk.bf16.vlgmr.msra.gmra.mrb[0].mxu0 %vm93_vm1, %v1388_v3  ;;  %s1489_s23 = scalar_lea.vmem %s1178_s22, 128  ;;  %p1494_p11 = scmp.lt.s32.totalorder %s1178_s22, %s1178_s22 }
  0x41   :  { %1269 = vmatprep.mubr.msk.bf16.mxu0 %vm1523_vm0, %v1522_v0  ;;  %p1490_p10 = scmp.ne.s32.totalorder %s1178_s22, %s1489_s23  ;;  %p1495_p12 = scmp.lt.s32.totalorder %s1489_s23, %s1489_s23 }
  0x43   :  { %p1496_p13 = por %p1495_p12, %p1494_p11 }
  0x45   :  { %p1497_p0 = pnand %p1496_p13, %p1490_p10 }
 0x113   :  { %v131_v5 = vpop.f32.mrb[0].mxu0 }
 0x114   :  { %v1259_v6 = vpop.f32.mrb[1].mxu0  ;;  %v132_v8 = vadd.f32 %v1190_v4, %v131_v5 }
 0x115   :  { %v134_v7 = vpop.f32.mrb[2].mxu0 }
 0x116   :  { %v135_v9 = vadd.f32 %v1190_v4, %v134_v7  ;;  %v1260_v10 = vpop.f32.mrb[3].mxu0 }
 0x118   :  { %v138_v11 = vpack.c.bf16 %v135_v9, %v132_v8 }
 0x11a   :  { %140 = vst.msk [vmem:[#allocation2] sm:$0xff] %vm139_vm2, %v138_v11 }
 0x121   :  { %v1634_v12 = vld [vmem:[#allocation2] sm:$0xf]  ;;  %v619_v16 = vld [vmem:[#allocation2] sm:$0xf0] }
 0x122   :  { %v1636_v13 = vld [vmem:[#allocation2] sm:$0xf]  ;;  %264 = vrot.lane.b32.xlu1 %v1634_v12, %s1524_s7  ;;  %v1648_v17 = vrot.slane %v619_v16, 4  ;;  %v736_v18 = vld [vmem:[#allocation2] sm:$0xf0] }
 0x123   :  { %149 = vrot.lane.b32.xlu0 %v1636_v13, %s1525_s8  ;;  %v1640_v14 = vld [vmem:[#allocation2] sm:$0xf]  ;;  %v1652_v19 = vrot.slane %v736_v18, 4  ;;  %v857_v20 = vld [vmem:[#allocation2] sm:$0xf0] }
 0x124   :  { %v1644_v15 = vld [vmem:[#allocation2] sm:$0xf]  ;;  %v1656_v21 = vrot.slane %v857_v20, 4  ;;  %v978_v22 = vld [vmem:[#allocation2] sm:$0xf0] }
 0x125   :  { %v1660_v23 = vrot.slane %v978_v22, 4 }
 0x126   :  { %385 = vrot.lane.b32.xlu1 %v1640_v14, %s1526_s2 }
 0x127   :  { %266 = vrot.lane.b32.xlu0 %v1634_v12, %s1527_s9 }
 0x12a   :  { %504 = vrot.lane.b32.xlu1 %v1644_v15, %s1528_s10 }
 0x12b   :  { %383 = vrot.lane.b32.xlu0 %v1640_v14, %s1529_s11 }
 0x12e   :  { %622 = vrot.lane.b32.xlu1 %v1648_v17, %s1525_s8 }
 0x12f   :  { %502 = vrot.lane.b32.xlu0 %v1644_v15, %s1530_s12 }
 0x132   :  { %739 = vrot.lane.b32.xlu1 %v1652_v19, %s1524_s7 }
 0x133   :  { %741 = vrot.lane.b32.xlu0 %v1652_v19, %s1527_s9 }
 0x136   :  { %860 = vrot.lane.b32.xlu1 %v1656_v21, %s1529_s11 }
 0x137   :  { %862 = vrot.lane.b32.xlu0 %v1656_v21, %s1526_s2 }
 0x13a   :  { %981 = vrot.lane.b32.xlu1 %v1660_v23, %s1530_s12 }
 0x13b   :  { %983 = vrot.lane.b32.xlu0 %v1660_v23, %s1528_s10 }
 0x194   :  { %v265_v27 = vpop.permute.xlu1 %264 }
 0x195   :  { %v150_v24 = vpop.permute.xlu0 %149 }
 0x196   :  { %v156_v25 = vsel %vm151_vm3, %v150_v24, 0 }
 0x197   :  { %1262 = vmatpush3.bf16.xpose.msra.mxu1 %v156_v25 }
 0x198   :  { %1273 = vmatprep.subr.bf16.mxu1 %v1522_v0  ;;  %v386_v29 = vpop.permute.xlu1 %385 }
 0x199   :  { %v267_v26 = vpop.permute.xlu0 %266  ;;  %v391_v30 = vsel %vm151_vm3, %v386_v29, 0 }
 0x19a   :  { %v272_v28 = vsel %vm151_vm3, %v267_v26, 0 }
 0x19c   :  { %v505_v31 = vpop.permute.xlu1 %504 }
 0x19d   :  { %v384_v32 = vpop.permute.xlu0 %383  ;;  %v510_v33 = vsel %vm151_vm3, %v505_v31, 0 }
 0x19e   :  { %1264 = vmatmul.mubr.msk.bf16.vlgmr.msra.gmra.mrb[0].mxu1 %vm151_vm3, %v1636_v13 }
 0x19f   :  { %1274 = vmatpush3.bf16.xpose.msra.mxu1 %v272_v28  ;;  %1275 = vmatprep.mubr.msk.bf16.mxu1 %vm1523_vm0, %v1522_v0 }
 0x1a0   :  { %1285 = vmatprep.subr.bf16.mxu1 %v1522_v0  ;;  %v623_v34 = vpop.permute.xlu1 %622 }
 0x1a1   :  { %v503_v35 = vpop.permute.xlu0 %502  ;;  %v628_v36 = vsel %vm151_vm3, %v623_v34, 0 }
 0x1a4   :  { %v740_v40 = vpop.permute.xlu1 %739 }
 0x1a5   :  { %v742_v37 = vpop.permute.xlu0 %741 }
 0x1a6   :  { %1276 = vmatmul.mubr.msk.bf16.vlgmr.msra.gmra.mrb[4].mxu1 %vm151_vm3, %v265_v27  ;;  %v747_v38 = vsel %vm151_vm3, %v742_v37, 0 }
 0x1a7   :  { %1286 = vmatpush3.bf16.xpose.msra.mxu1 %v391_v30  ;;  %1287 = vmatprep.mubr.msk.bf16.mxu1 %vm1523_vm0, %v1522_v0 }
 0x1a8   :  { %1297 = vmatprep.subr.bf16.mxu1 %v1522_v0  ;;  %v861_v43 = vpop.permute.xlu1 %860 }
 0x1a9   :  { %v863_v39 = vpop.permute.xlu0 %862 }
 0x1aa   :  { %v868_v41 = vsel %vm151_vm3, %v863_v39, 0 }
 0x1ac   :  { %v982_v45 = vpop.permute.xlu1 %981 }
 0x1ad   :  { %v984_v42 = vpop.permute.xlu0 %983 }
 0x1ae   :  { %1288 = vmatmul.mubr.msk.bf16.vlgmr.msra.gmra.mrb[8].mxu1 %vm151_vm3, %v384_v32  ;;  %v989_v44 = vsel %vm151_vm3, %v984_v42, 0 }
 0x1af   :  { %1298 = vmatpush3.bf16.xpose.msra.mxu1 %v510_v33  ;;  %1299 = vmatprep.mubr.msk.bf16.mxu1 %vm1523_vm0, %v1522_v0 }
 0x1b0   :  { %1309 = vmatprep.subr.bf16.mxu1 %v1522_v0 }
 0x1b6   :  { %1300 = vmatmul.mubr.msk.bf16.vlgmr.msra.gmra.mrb[12].mxu1 %vm151_vm3, %v503_v35 }
 0x1b7   :  { %1310 = vmatpush3.bf16.xpose.msra.mxu1 %v628_v36  ;;  %1311 = vmatprep.mubr.msk.bf16.mxu1 %vm1523_vm0, %v1522_v0 }
 0x1b8   :  { %1321 = vmatprep.subr.bf16.mxu1 %v1522_v0 }
 0x1be   :  { %1312 = vmatmul.mubr.msk.bf16.vlgmr.msra.gmra.mrb[16].mxu1 %vm151_vm3, %v1648_v17 }
 0x1bf   :  { %1322 = vmatpush3.bf16.xpose.msra.mxu1 %v747_v38  ;;  %1323 = vmatprep.mubr.msk.bf16.mxu1 %vm1523_vm0, %v1522_v0 }
 0x1c0   :  { %1333 = vmatprep.subr.bf16.mxu1 %v1522_v0 }
 0x1c6   :  { %1324 = vmatmul.mubr.msk.bf16.vlgmr.msra.gmra.mrb[20].mxu1 %vm151_vm3, %v740_v40 }
 0x1c7   :  { %1334 = vmatpush3.bf16.xpose.msra.mxu1 %v868_v41  ;;  %1335 = vmatprep.mubr.msk.bf16.mxu1 %vm1523_vm0, %v1522_v0 }
 0x1c8   :  { %1345 = vmatprep.subr.bf16.mxu1 %v1522_v0 }
 0x1ce   :  { %1336 = vmatmul.mubr.msk.bf16.vlgmr.msra.gmra.mrb[24].mxu1 %vm151_vm3, %v861_v43 }
 0x1cf   :  { %1346 = vmatpush3.bf16.xpose.msra.mxu1 %v989_v44  ;;  %1347 = vmatprep.mubr.msk.bf16.mxu1 %vm1523_vm0, %v1522_v0 }
 0x1d0   :  { %1357 = vmatprep.subr.bf16.mxu1 %v1522_v0 }
 0x1d6   :  { %1348 = vmatmul.mubr.msk.bf16.vlgmr.msra.gmra.mrb[28].mxu1 %vm151_vm3, %v982_v45 }
 0x1d7   :  { %1361 = vmatprep.mubr.msk.bf16.mxu1 %vm1523_vm0, %v1522_v0 }
 0x271   :  { %v192_v50 = vpop.f32.mrb[0].mxu1 }
 0x272   :  { %v193_v51 = vadd.f32 %v192_v50, %v146_v49  ;;  %v1265_v52 = vpop.f32.mrb[1].mxu1 }
 0x273   :  { %v195_v53 = vpop.f32.mrb[2].mxu1 }
 0x274   :  { %v1266_v54 = vpop.f32.mrb[3].mxu1  ;;  %v198_v55 = vsel %vm151_vm3, %v193_v51, -inf }
 0x275   :  { %199 = vmax.xlane.f32.xlu0 %v198_v55 }
 0x279   :  { %v308_v56 = vpop.f32.mrb[4].mxu1 }
 0x27a   :  { %v309_v57 = vadd.f32 %v308_v56, %v146_v49  ;;  %v1277_v58 = vpop.f32.mrb[5].mxu1 }
 0x27b   :  { %v311_v59 = vpop.f32.mrb[6].mxu1 }
 0x27c   :  { %v1278_v60 = vpop.f32.mrb[7].mxu1  ;;  %v314_v61 = vsel %vm151_vm3, %v309_v57, -inf }
 0x27d   :  { %315 = vmax.xlane.f32.xlu1 %v314_v61 }
 0x281   :  { %v427_v62 = vpop.f32.mrb[8].mxu1 }
 0x282   :  { %v428_v63 = vadd.f32 %v427_v62, %v146_v49  ;;  %v1289_v1 = vpop.f32.mrb[9].mxu1 }
 0x283   :  { %v430_v2 = vpop.f32.mrb[10].mxu1 }
 0x284   :  { %v1290_v3 = vpop.f32.mrb[11].mxu1  ;;  %v433_v4 = vsel %vm151_vm3, %v428_v63, -inf }
 0x285   :  { %434 = vmax.xlane.f32.xlu0 %v433_v4 }
 0x289   :  { %v546_v5 = vpop.f32.mrb[12].mxu1 }
 0x28a   :  { %v1710_v6 = vadd.f32 %v546_v5, %v146_v49  ;;  %v1301_v7 = vpop.f32.mrb[13].mxu1 }
 0x28b   :  { %v549_v8 = vpop.f32.mrb[14].mxu1 }
 0x28c   :  { %v1302_v9 = vpop.f32.mrb[15].mxu1  ;;  %v552_v10 = vsel %vm151_vm3, %v1710_v6, -inf }
 0x28d   :  { %553 = vmax.xlane.f32.xlu0 %v552_v10 }
 0x291   :  { %v664_v11 = vpop.f32.mrb[16].mxu1 }
 0x292   :  { %v1714_v16 = vadd.f32 %v664_v11, %v146_v49  ;;  %v1313_v18 = vpop.f32.mrb[17].mxu1 }
 0x293   :  { %v667_v20 = vpop.f32.mrb[18].mxu1 }
 0x294   :  { %v1314_v22 = vpop.f32.mrb[19].mxu1  ;;  %v670_v24 = vsel %vm151_vm3, %v1714_v16, -inf }
 0x295   :  { %671 = vmax.xlane.f32.xlu1 %v670_v24 }
 0x299   :  { %v783_v25 = vpop.f32.mrb[20].mxu1 }
 0x29a   :  { %v1718_v26 = vadd.f32 %v783_v25, %v146_v49  ;;  %v1325_v27 = vpop.f32.mrb[21].mxu1 }
 0x29b   :  { %v786_v28 = vpop.f32.mrb[22].mxu1 }
 0x29c   :  { %v1326_v29 = vpop.f32.mrb[23].mxu1  ;;  %v789_v30 = vsel %vm151_vm3, %v1718_v26, -inf }
 0x29d   :  { %790 = vmax.xlane.f32.xlu0 %v789_v30 }
 0x2a1   :  { %v904_v31 = vpop.f32.mrb[24].mxu1 }
 0x2a2   :  { %v905_v32 = vadd.f32 %v904_v31, %v146_v49  ;;  %v1337_v33 = vpop.f32.mrb[25].mxu1 }
 0x2a3   :  { %v907_v34 = vpop.f32.mrb[26].mxu1 }
 0x2a4   :  { %v1338_v35 = vpop.f32.mrb[27].mxu1  ;;  %v910_v36 = vsel %vm151_vm3, %v905_v32, -inf }
 0x2a5   :  { %911 = vmax.xlane.f32.xlu1 %v910_v36 }
 0x2a9   :  { %v1025_v37 = vpop.f32.mrb[28].mxu1 }
 0x2aa   :  { %v1723_v38 = vadd.f32 %v1025_v37, %v146_v49  ;;  %v1349_v39 = vpop.f32.mrb[29].mxu1 }
 0x2ab   :  { %v1028_v40 = vpop.f32.mrb[30].mxu1 }
 0x2ac   :  { %v1350_v41 = vpop.f32.mrb[31].mxu1  ;;  %v1031_v42 = vsel %vm151_vm3, %v1723_v38, -inf }
 0x2b3   :  { %326 = vrot.lane.b32.xlu0 %v1634_v12, %s1531_s13 }
 0x2b6   :  { %210 = vrot.lane.b32.xlu1 %v1636_v13, %s1519_s30 }
 0x2d2   :  { %1032 = vmax.xlane.f32.xlu0 %v1031_v42 }
 0x302   :  { %v200_v43 = vpop.xlane.xlu0 %199 }
 0x303   :  { %v201_v44 = vsub.f32 %v193_v51, %v200_v43 }
 0x305   :  { %v202_v45 = vmul.f32 1.442695, %v201_v44 }
 0x307   :  { %1391 = vpow2.f32 %v202_v45 }
 0x30a   :  { %v316_v46 = vpop.xlane.xlu1 %315 }
 0x30b   :  { %v317_v47 = vsub.f32 %v309_v57, %v316_v46 }
 0x30d   :  { %v318_v48 = vmul.f32 1.442695, %v317_v47 }
 0x30f   :  { %1393 = vpow2.f32 %v318_v48 }
 0x311   :  { %v1731_v49 = vpop.eup %1391 }
 0x312   :  { %v435_v50 = vpop.xlane.xlu0 %434  ;;  %v204_v12 = vsel %vm151_vm3, %v1731_v49, 0.0 }
 0x313   :  { %v436_v52 = vsub.f32 %v428_v63, %v435_v50  ;;  %205 = vadd.xlane.f32.xlu1 %v204_v12 }
 0x315   :  { %v437_v13 = vmul.f32 1.442695, %v436_v52 }
 0x317   :  { %1395 = vpow2.f32 %v437_v13 }
 0x319   :  { %v1735_v53 = vpop.eup %1393 }
 0x31a   :  { %v320_v51 = vsel %vm151_vm3, %v1735_v53, 0.0  ;;  %v554_v59 = vpop.xlane.xlu0 %553 }
 0x31b   :  { %321 = vadd.xlane.f32.xlu0 %v320_v51  ;;  %v555_v61 = vsub.f32 %v1710_v6, %v554_v59 }
 0x31d   :  { %v556_v62 = vmul.f32 1.442695, %v555_v61 }
 0x31f   :  { %1397 = vpow2.f32 %v556_v62 }
 0x321   :  { %v1739_v54 = vpop.eup %1395 }
 0x322   :  { %v439_v55 = vsel %vm151_vm3, %v1739_v54, 0.0  ;;  %v672_v56 = vpop.xlane.xlu1 %671 }
 0x323   :  { %440 = vadd.xlane.f32.xlu1 %v439_v55  ;;  %v673_v63 = vsub.f32 %v1714_v16, %v672_v56 }
 0x325   :  { %v674_v2 = vmul.f32 1.442695, %v673_v63 }
 0x327   :  { %1399 = vpow2.f32 %v674_v2 }
 0x329   :  { %v1398_v5 = vpop.eup %1397 }
 0x32a   :  { %v791_v1 = vpop.xlane.xlu0 %790  ;;  %v558_v7 = vsel %vm151_vm3, %v1398_v5, 0.0 }
 0x32e   :  { %v327_v18 = vpop.permute.xlu0 %326 }
 0x32f   :  { %v332_v30 = vsel %vm215_vm5, %v327_v18, 0 }
 0x331   :  { %445 = vrot.lane.b32.xlu0 %v1640_v14, %s1532_s14  ;;  %v792_v14 = vsub.f32 %v1718_v26, %v791_v1  ;;  %v1753_v8 = vpop.eup %1399 }
 0x332   :  { %v912_v57 = vpop.xlane.xlu1 %911  ;;  %v676_v9 = vsel %vm151_vm3, %v1753_v8, 0.0 }
 0x333   :  { %v913_v3 = vsub.f32 %v905_v32, %v912_v57 }
 0x334   :  { %564 = vrot.lane.b32.xlu1 %v1644_v15, %s1533_s15  ;;  %v793_v15 = vmul.f32 1.442695, %v792_v14 }
 0x335   :  { %v914_v4 = vmul.f32 1.442695, %v913_v3 }
 0x336   :  { %v211_v58 = vpop.permute.xlu1 %210  ;;  %1401 = vpow2.f32 %v793_v15 }
 0x337   :  { %v217_v60 = vsel %vm215_vm5, %v211_v58, 0  ;;  %1403 = vpow2.f32 %v914_v4 }
 0x338   :  { %1268 = vmatpush3.bf16.msra.mxu0 %v217_v60 }
 0x339   :  { %1279 = vmatprep.subr.bf16.mxu0 %v1522_v0 }
 0x340   :  { %v1755_v6 = vpop.eup %1401 }
 0x341   :  { %v1759_v10 = vpop.eup %1403  ;;  %v795_v16 = vsel %vm151_vm3, %v1755_v6, 0.0 }
 0x342   :  { %v916_v11 = vsel %vm151_vm3, %v1759_v10, 0.0 }
 0x350   :  { %559 = vadd.xlane.f32.xlu0 %v558_v7 }
 0x354   :  { %677 = vadd.xlane.f32.xlu0 %v676_v9 }
 0x358   :  { %917 = vadd.xlane.f32.xlu0 %v916_v11  ;;  %796 = vadd.xlane.f32.xlu1 %v795_v16 }
 0x35f   :  { %v1033_v20 = vpop.xlane.xlu0 %1032 }
 0x360   :  { %v1034_v22 = vsub.f32 %v1723_v38, %v1033_v20 }
 0x362   :  { %v1035_v24 = vmul.f32 1.442695, %v1034_v22 }
 0x364   :  { %1405 = vpow2.f32 %v1035_v24 }
 0x369   :  { %801 = vrot.lane.b32.xlu1 %v1652_v19, %s1531_s13 }
 0x36d   :  { %922 = vrot.lane.b32.xlu1 %v1656_v21, %s1532_s14 }
 0x36e   :  { %v1770_v25 = vpop.eup %1405 }
 0x36f   :  { %v1037_v26 = vsel %vm151_vm3, %v1770_v25, 0.0 }
 0x370   :  { %1038 = vadd.xlane.f32.xlu0 %v1037_v26 }
 0x371   :  { %1043 = vrot.lane.b32.xlu1 %v1660_v23, %s1533_s15 }
 0x386   :  { %682 = vrot.lane.b32.xlu0 %v1648_v17, %s1519_s30 }
 0x3a0   :  { %v206_v27 = vpop.xlane.xlu1 %205 }
 0x3a1   :  { %1407 = vrcp.f32 %v206_v27 }
 0x3a8   :  { %v322_v28 = vpop.xlane.xlu0 %321 }
 0x3a9   :  { %1409 = vrcp.f32 %v322_v28 }
 0x3ab   :  { %v1408_v19 = vpop.eup %1407 }
 0x3ac   :  { %v208_v29 = vmul.f32 %v1408_v19, %v1731_v49  ;;  %v446_v32 = vpop.permute.xlu0 %445 }
 0x3ad   :  { %v451_v34 = vsel %vm215_vm5, %v446_v32, 0 }
 0x3ae   :  { %v209_v21 = vpack.c.bf16 %v208_v29, %v208_v29 }
 0x3b0   :  { %1270 = vmatmul.mubr.msk.bf16.vlgmr.msra.gmra.mrb[4].mxu0 %vm151_vm3, %v209_v21  ;;  %v441_v31 = vpop.xlane.xlu1 %440 }
 0x3b1   :  { %1411 = vrcp.f32 %v441_v31  ;;  %1280 = vmatpush3.bf16.msra.mxu0 %v332_v30  ;;  %1281 = vmatprep.mubr.msk.bf16.mxu0 %vm1523_vm0, %v1522_v0 }
 0x3b2   :  { %1291 = vmatprep.subr.bf16.mxu0 %v1522_v0 }
 0x3b3   :  { %v1410_v17 = vpop.eup %1409 }
 0x3b4   :  { %v324_v23 = vmul.f32 %v1410_v17, %v1735_v53  ;;  %v565_v37 = vpop.permute.xlu1 %564 }
 0x3b5   :  { %v570_v39 = vsel %vm215_vm5, %v565_v37, 0 }
 0x3b6   :  { %v325_v33 = vpack.c.bf16 %v324_v23, %v324_v23 }
 0x3b8   :  { %1282 = vmatmul.mubr.msk.bf16.vlgmr.msra.gmra.mrb[8].mxu0 %vm151_vm3, %v325_v33 }
 0x3b9   :  { %1292 = vmatpush3.bf16.msra.mxu0 %v451_v34  ;;  %1293 = vmatprep.mubr.msk.bf16.mxu0 %vm1523_vm0, %v1522_v0 }
 0x3ba   :  { %1303 = vmatprep.subr.bf16.mxu0 %v1522_v0 }
 0x3bb   :  { %v1412_v35 = vpop.eup %1411 }
 0x3bc   :  { %v443_v36 = vmul.f32 %v1412_v35, %v1739_v54 }
 0x3be   :  { %v444_v38 = vpack.c.bf16 %v443_v36, %v443_v36 }
 0x3c0   :  { %1294 = vmatmul.mubr.msk.bf16.vlgmr.msra.gmra.mrb[12].mxu0 %vm151_vm3, %v444_v38  ;;  %v1389_v38 = vld [vmem:[#allocation9] sm:$0xff]  }
 0x3c1   :  { %1304 = vmatpush3.bf16.msra.mxu0 %v570_v39  ;;  %1305 = vmatprep.mubr.msk.bf16.mxu0 %vm1523_vm0, %v1522_v0 }
 0x3c2   :  { %1315 = vmatprep.subr.bf16.mxu0 %v1522_v0  ;;  %1358 = vmatpush3.bf16.msra.mxu1 %v1389_v38 }
 0x3c3   :  { %1359 = vmatprep.subr.bf16.mxu1 %v1522_v0 }
 0x3dd   :  { %v560_v40 = vpop.xlane.xlu0 %559 }
 0x3de   :  { %1413 = vrcp.f32 %v560_v40 }
 0x3e1   :  { %v678_v44 = vpop.xlane.xlu0 %677 }
 0x3e2   :  { %1415 = vrcp.f32 %v678_v44 }
 0x3e5   :  { %v797_v45 = vpop.xlane.xlu1 %796  ;;  %v918_v46 = vpop.xlane.xlu0 %917 }
 0x3e6   :  { %1417 = vrcp.f32 %v797_v45 }
 0x3e7   :  { %1419 = vrcp.f32 %v918_v46 }
 0x3e8   :  { %v1414_v41 = vpop.eup %1413 }
 0x3e9   :  { %v562_v42 = vmul.f32 %v1414_v41, %v1398_v5  ;;  %v802_v52 = vpop.permute.xlu1 %801 }
 0x3ea   :  { %v807_v51 = vsel %vm215_vm5, %v802_v52, 0 }
 0x3eb   :  { %v563_v43 = vpack.c.bf16 %v562_v42, %v562_v42  ;;  %v1390_v42 = vld [vmem:[#allocation9 + $0x8] sm:$0xff]  }
 0x3ec   :  { %v1416_v47 = vpop.eup %1415  ;;  %1360 = vmatpush3.bf16.msra.mxu1 %v1390_v42 }
 0x3ed   :  { %1306 = vmatmul.mubr.msk.bf16.vlgmr.msra.gmra.mrb[16].mxu0 %vm151_vm3, %v563_v43  ;;  %v680_v49 = vmul.f32 %v1416_v47, %v1753_v8  ;;  %v923_v55 = vpop.permute.xlu1 %922 }
 0x3ee   :  { %1317 = vmatprep.mubr.msk.bf16.mxu0 %vm1523_vm0, %v1522_v0  ;;  %v928_v58 = vsel %vm215_vm5, %v923_v55, 0  ;;  %v1211_v55 = vld [vmem:[%s1850_s4] ss:$0 sm:$0xff] }
 0x3ef   :  { %v681_v13 = vpack.c.bf16 %v680_v49, %v680_v49 }
 0x3f0   :  { %v1418_v53 = vpop.eup %1417 }
 0x3f1   :  { %v799_v54 = vmul.f32 %v1418_v53, %v1755_v6  ;;  %v1420_v57 = vpop.eup %1419  ;;  %v1044_v60 = vpop.permute.xlu1 %1043 }
 0x3f2   :  { %v920_v59 = vmul.f32 %v1420_v57, %v1759_v10  ;;  %v1049_v63 = vsel %vm215_vm5, %v1044_v60, 0 }
 0x3f3   :  { %v800_v56 = vpack.c.bf16 %v799_v54, %v799_v54 }
 0x3f4   :  { %v921_v61 = vpack.c.bf16 %v920_v59, %v920_v59 }
 0x3fd   :  { %v1039_v48 = vpop.xlane.xlu0 %1038 }
 0x3fe   :  { %1421 = vrcp.f32 %v1039_v48 }
 0x401   :  { %v683_v50 = vpop.permute.xlu0 %682 }
 0x402   :  { %v688_v12 = vsel %vm215_vm5, %v683_v50, 0 }
 0x403   :  { %1316 = vmatpush3.bf16.msra.mxu0 %v688_v12 }
 0x404   :  { %1327 = vmatprep.subr.bf16.mxu0 %v1522_v0 }
 0x406   :  { %1318 = vmatmul.mubr.msk.bf16.vlgmr.msra.gmra.mrb[20].mxu0 %vm151_vm3, %v681_v13 }
 0x407   :  { %1328 = vmatpush3.bf16.msra.mxu0 %v807_v51  ;;  %1329 = vmatprep.mubr.msk.bf16.mxu0 %vm1523_vm0, %v1522_v0 }
 0x408   :  { %1339 = vmatprep.subr.bf16.mxu0 %v1522_v0  ;;  %v1422_v62 = vpop.eup %1421 }
 0x409   :  { %v1041_v1 = vmul.f32 %v1422_v62, %v1770_v25 }
 0x40b   :  { %v1042_v14 = vpack.c.bf16 %v1041_v1, %v1041_v1 }
 0x40e   :  { %1330 = vmatmul.mubr.msk.bf16.vlgmr.msra.gmra.mrb[24].mxu0 %vm151_vm3, %v800_v56 }
 0x40f   :  { %1340 = vmatpush3.bf16.msra.mxu0 %v928_v58  ;;  %1341 = vmatprep.mubr.msk.bf16.mxu0 %vm1523_vm0, %v1522_v0 }
 0x410   :  { %1351 = vmatprep.subr.bf16.mxu0 %v1522_v0 }
 0x416   :  { %1342 = vmatmul.mubr.msk.bf16.vlgmr.msra.gmra.mrb[28].mxu0 %vm151_vm3, %v921_v61 }
 0x417   :  { %1352 = vmatpush3.bf16.msra.mxu0 %v1049_v63  ;;  %1353 = vmatprep.mubr.msk.bf16.mxu0 %vm1523_vm0, %v1522_v0 }
 0x41e   :  { %1354 = vmatmul.mubr.msk.bf16.vlgmr.msra.gmra.mrb[32].mxu0 %vm151_vm3, %v1042_v14 }
 0x483   :  { %v253_v2 = vpop.f32.mrb[4].mxu0 }
 0x484   :  { %v259_v3 = vpack.c.bf16 %v253_v2, %v253_v2  ;;  %v1271_v15 = vpop.f32.mrb[5].mxu0 }
 0x485   :  { %v256_v4 = vpop.f32.mrb[6].mxu0 }
 0x486   :  { %261 = vst.msk [vmem:[#allocation3] sm:$0xf] %vm260_vm6, %v259_v3  ;;  %v1272_v5 = vpop.f32.mrb[7].mxu0 }
 0x48b   :  { %v368_v7 = vpop.f32.mrb[8].mxu0 }
 0x48c   :  { %v374_v8 = vpack.c.bf16 %v368_v7, %v368_v7  ;;  %v1283_v6 = vpop.f32.mrb[9].mxu0 }
 0x48d   :  { %v371_v9 = vpop.f32.mrb[10].mxu0 }
 0x48e   :  { %376 = vrot.lane.b32.xlu1 %v374_v8, %s1534_s16  ;;  %v1284_v10 = vpop.f32.mrb[11].mxu0 }
 0x493   :  { %v487_v11 = vpop.f32.mrb[12].mxu0 }
 0x494   :  { %v493_v16 = vpack.c.bf16 %v487_v11, %v487_v11  ;;  %v1295_v18 = vpop.f32.mrb[13].mxu0 }
 0x495   :  { %v490_v20 = vpop.f32.mrb[14].mxu0 }
 0x496   :  { %495 = vrot.lane.b32.xlu0 %v493_v16, %s1535_s1  ;;  %v1296_v22 = vpop.f32.mrb[15].mxu0 }
 0x4c0   :  { %v606_v24 = vpop.f32.mrb[16].mxu0 }
 0x4c1   :  { %v612_v25 = vpack.c.bf16 %v606_v24, %v606_v24  ;;  %v1307_v26 = vpop.f32.mrb[17].mxu0 }
 0x4c2   :  { %v609_v27 = vpop.f32.mrb[18].mxu0 }
 0x4c3   :  { %614 = vrot.lane.b32.xlu0 %v612_v25, %s1536_s17  ;;  %v1308_v28 = vpop.f32.mrb[19].mxu0 }
 0x4d9   :  { %v724_v19 = vpop.f32.mrb[20].mxu0 }
 0x4da   :  { %v730_v29 = vpack.c.bf16 %v724_v19, %v724_v19  ;;  %v1319_v21 = vpop.f32.mrb[21].mxu0 }
 0x4db   :  { %v727_v30 = vpop.f32.mrb[22].mxu0 }
 0x4dc   :  { %v732_v31 = vrot.slane %v730_v29, 4  ;;  %v1320_v17 = vpop.f32.mrb[23].mxu0 }
 0x4de   :  { %735 = vst.msk [vmem:[#allocation3] sm:$0xf0] %vm734_vm7, %v732_v31 }
 0x4e1   :  { %v843_v23 = vpop.f32.mrb[24].mxu0 }
 0x4e2   :  { %v849_v32 = vpack.c.bf16 %v843_v23, %v843_v23  ;;  %v1331_v33 = vpop.f32.mrb[25].mxu0 }
 0x4e3   :  { %v846_v34 = vpop.f32.mrb[26].mxu0 }
 0x4e4   :  { %v851_v35 = vrot.slane %v849_v32, 4  ;;  %v1332_v36 = vpop.f32.mrb[27].mxu0 }
 0x4e6   :  { %852 = vrot.lane.b32.xlu1 %v851_v35, %s1534_s16 }
 0x4e9   :  { %v964_v37 = vpop.f32.mrb[28].mxu0 }
 0x4ea   :  { %v970_v39 = vpack.c.bf16 %v964_v37, %v964_v37  ;;  %v1343_v40 = vpop.f32.mrb[29].mxu0 }
 0x4eb   :  { %v967_v41 = vpop.f32.mrb[30].mxu0 }
 0x4ec   :  { %v972_v43 = vrot.slane %v970_v39, 4  ;;  %v1344_v44 = vpop.f32.mrb[31].mxu0 }
 0x4ee   :  { %973 = vrot.lane.b32.xlu1 %v972_v43, %s1535_s1 }
 0x4f1   :  { %v1085_v45 = vpop.f32.mrb[32].mxu0 }
 0x4f2   :  { %v1091_v46 = vpack.c.bf16 %v1085_v45, %v1085_v45  ;;  %v1355_v47 = vpop.f32.mrb[33].mxu0 }
 0x4f3   :  { %v1088_v48 = vpop.f32.mrb[34].mxu0 }
 0x4f4   :  { %v1093_v49 = vrot.slane %v1091_v46, 4  ;;  %v1356_v50 = vpop.f32.mrb[35].mxu0 }
 0x4f6   :  { %1094 = vrot.lane.b32.xlu1 %v1093_v49, %s1536_s17 }
 0x500   :  { %v377_v12 = vpop.permute.xlu1 %376 }
 0x501   :  { %380 = vst.msk [vmem:[#allocation3] sm:$0xf] %vm379_vm8, %v377_v12 }
 0x508   :  { %v496_v52 = vpop.permute.xlu0 %495 }
 0x509   :  { %499 = vst.msk [vmem:[#allocation3] sm:$0xf] %vm498_vm9, %v496_v52 }
 0x535   :  { %v615_v13 = vpop.permute.xlu0 %614 }
 0x536   :  { %618 = vst.msk [vmem:[#allocation3] sm:$0xf] %vm617_vm10, %v615_v13 }
 0x558   :  { %v853_v0 = vpop.permute.xlu1 %852 }
 0x559   :  { %856 = vst.msk [vmem:[#allocation3] sm:$0xf0] %vm855_vm11, %v853_v0 }
 0x560   :  { %v974_v53 = vpop.permute.xlu1 %973 }
 0x561   :  { %977 = vst.msk [vmem:[#allocation3] sm:$0xf0] %vm976_vm12, %v974_v53 }
 0x568   :  { %v1095_v51 = vpop.permute.xlu1 %1094 }
 0x569   :  { %1098 = vst.msk [vmem:[#allocation3] sm:$0xf0] %vm1097_vm13, %v1095_v51 }
 0x570   :  { %v1099_v54 = vld [vmem:[#allocation3] sm:$0xff] }
 0x571   :  { %1362 = vmatmul.mubr.msk.bf16.vlgmr.msra.gmra.mrb[32].mxu1 %vm93_vm1, %v1099_v54 }
 0x644   :  { %v1160_v56 = vpop.f32.mrb[32].mxu1 }
 0x645   :  { %v1161_v57 = vadd.f32 %v1211_v55, %v1160_v56  ;;  %v1363_v58 = vpop.f32.mrb[33].mxu1 }
 0x646   :  { %v1163_v59 = vpop.f32.mrb[34].mxu1 }
 0x647   :  { %v1167_v60 = vpack.c.bf16 %v1161_v57, %v1161_v57  ;;  %v1164_v61 = vadd.f32 %v1211_v55, %v1163_v59  ;;  %v1364_v62 = vpop.f32.mrb[35].mxu1 }
 0x649   :  { %v1168_v63 = vpack.c.bf16 %v1164_v61, %v1164_v61  ;;  %1170 = vst.msk [vmem:[#allocation10] sm:$0xf] %vm1169_vm14, %v1167_v60 }
 0x64b   :  { %1171 = vst.msk [vmem:[#allocation10 + $0x4] sm:$0xf] %vm1169_vm14, %v1168_v63 }
 0x64c   :  { %1500 = shalt.err (!%p1497_p0)
}
 0x64d   :  { %s1501_s25 = scalar_lea.hbm %s1851_s5, 128 }
 0x64e   :  { %p1502_p1 = scmp.ne.s32.totalorder %s1851_s5, %s1501_s25  ;;  %p1505_p2 = scmp.lt.u32.totalorder %s1501_s25, %s1851_s5 }
 0x650   :  { %p1507_p3 = pnand %p1505_p2, %p1502_p1 }
 0x652   :  { %1510 = shalt.err (!%p1507_p3)
}
 0x653   :  { %1183 = dma.vmem_to_hbm [thread:$0]  %s1178_s22, 128, %s1851_s5, [#allocation6], %s1519_s30, %s1519_s30, %s1520_s6  }
 0x654   :  { %1515 = dma.done.wait [#allocation6], 128  }
 0x655   :  { %1516 = vsyncadd [#allocation6], 4294967168 }
 0x656   :  { %1187 = vsyncpa [#allocation5], 1 }
 0x657   :  { %1188 = vsyncpa [#allocation8], 1 }
 0x658   :  { %1189 = vsyncpa [#allocation6], 1 }

</bundles_post_ra>
